<compile_context>
chip_gen: v7x
topology: tpu7x:2x2x1
jax: 0.10.0
libtpu: 0.0.40
codegen_flags: <defaults>
</compile_context>

<pallas_src>
import jax
import jax.numpy as jnp
from jax.experimental import pallas as pl
from jax.experimental.pallas import tpu as pltpu


# --------------------------------------------------------------------------
# Kernel body: element-wise ELU(x) + 1 on one [tile_rows, W] VMEM tile.
# --------------------------------------------------------------------------
def _elu_plus_one_kernel(x_ref, o_ref):
    x = x_ref[...]
    # Native compute for f32 / bf16 (bf16 VPU+EUP on v6e/v7x; Mosaic promotes
    # internally on v5e). Anything else is promoted to f32.
    if x.dtype not in (jnp.float32, jnp.bfloat16):
        x = x.astype(jnp.float32)
    # exp on a clamped argument: identical result (the select discards the
    # other branch) but never produces inf for large positive x.
    e = jnp.exp(jnp.minimum(x, 0.0))
    y = jnp.where(x > 0, x + 1.0, e)
    o_ref[...] = y.astype(o_ref.dtype)


# Plain-JAX version for the (< W element) ragged tail.
def _elu_plus_one_jnp(x):
    xc = x if x.dtype in (jnp.float32, jnp.bfloat16) else x.astype(jnp.float32)
    y = jnp.where(xc > 0, xc + 1.0, jnp.exp(jnp.minimum(xc, 0.0)))
    return y.astype(x.dtype)


# --------------------------------------------------------------------------
# Tiling helpers.
# --------------------------------------------------------------------------
def _round_up(a, b):
    return ((a + b - 1) // b) * b


def _exact_lane_width(n):
    """Lane-dense width W (multiple of 128) that exactly divides n, or None."""
    if n % 128 != 0:
        return None
    for w in (8192, 4096, 2048, 1024, 512, 256, 128):
        if n % w == 0 and n // w >= 8:
            return w
    return 128  # tiny multiple-of-128 array (M < 8): full-extent block.


def _bulk_lane_width(n):
    """Lane-dense width for the bulk of a ragged-total array (W need not divide n)."""
    for w in (1024, 512, 256, 128):
        if n // w >= 8:
            return w
    return 128 if n >= 128 else None


def _run_tiled(x2, block_bytes):
    """Apply the kernel to a contiguous lane-dense [M, W] view (W % 128 == 0)."""
    M, W = x2.shape
    itemsize = jnp.dtype(x2.dtype).itemsize
    # Sublane packing multiple per dtype: 8 for f32, 16 for bf16, 32 for 8-bit.
    sub = max(8, 32 // itemsize)

    target_rows = max(sub, (block_bytes // (W * itemsize)) // sub * sub)
    if M * W * itemsize > 512 * 1024:
        # Force >= ~4 grid steps: software pipelining everywhere, and room for
        # 2-TC sharding on v7x.
        target_rows = min(target_rows, max(sub, _round_up(pl.cdiv(M, 4), sub)))

    if M <= target_rows:
        tile_rows = M            # full-extent block: always a legal shape
    else:
        tile_rows = target_rows  # multiple of `sub`; ragged last block clipped

    grid = (pl.cdiv(M, tile_rows),)

    # Explicit scoped-VMEM budget: in+out, double-buffered, plus slack.
    block_footprint = tile_rows * W * itemsize
    vmem_limit = min(max(4 * block_footprint + (2 << 20), 16 << 20), 56 << 20)

    return pl.pallas_call(
        _elu_plus_one_kernel,
        out_shape=jax.ShapeDtypeStruct((M, W), x2.dtype),
        grid_spec=pltpu.PrefetchScalarGridSpec(
            num_scalar_prefetch=0,
            grid=grid,
            in_specs=[pl.BlockSpec((tile_rows, W), lambda i: (i, 0))],
            out_specs=pl.BlockSpec((tile_rows, W), lambda i: (i, 0)),
        ),
        compiler_params=pltpu.CompilerParams(
            dimension_semantics=("parallel",),
            vmem_limit_bytes=vmem_limit,
        ),
    )(x2)


# --------------------------------------------------------------------------
# Public wrapper: performer feature map  y = elu(x) + 1, any shape [..., D].
# --------------------------------------------------------------------------
def activation_feature_map(x, *, block_bytes=4 * 1024 * 1024):
    orig_shape = x.shape
    n = x.size
    if n == 0:
        return x

    W = _exact_lane_width(n)
    if W is not None:
        # Zero-copy lane-dense view covering the whole array.
        x2 = x.reshape(n // W, W)
        return _run_tiled(x2, block_bytes).reshape(orig_shape)

    # Ragged total element count: lane-dense Pallas pass over the bulk,
    # tiny (< W elements) tail in plain jnp, so >99% of stores stay unmasked.
    x_flat = x.reshape(-1)
    W = _bulk_lane_width(n)
    if W is None:
        # Fewer than 128 elements total: not worth a kernel launch.
        return _elu_plus_one_jnp(x_flat).reshape(orig_shape)

    n_main = (n // W) * W
    bulk = _run_tiled(x_flat[:n_main].reshape(n_main // W, W), block_bytes)
    tail = _elu_plus_one_jnp(x_flat[n_main:])
    out_flat = jnp.concatenate([bulk.reshape(-1), tail])
    return out_flat.reshape(orig_shape)


# Pure-JAX reference (f32 accumulation) for correctness checking.
def _ref(x):
    xf = x.astype(jnp.float32)
    return (jnp.where(xf > 0, xf, jnp.exp(xf) - 1.0) + 1.0).astype(x.dtype)


if __name__ == "__main__":
    key = jax.random.PRNGKey(0)
    k0, k1, k2, k3 = jax.random.split(key, 4)

    # Canonical performer-like shape: [batch, seq, heads, query_dims].
    batch, seq, heads, query_dims = 2, 8, 4, 32
    x = jax.random.normal(k0, (batch, seq, heads, query_dims), dtype=jnp.float32)
    y = jax.block_until_ready(activation_feature_map(x))
    assert y.shape == x.shape and y.dtype == x.dtype
    assert jnp.allclose(y, _ref(x), atol=1e-6, rtol=1e-6)

    # Ragged total element count (not a multiple of 128) -> lane-dense bulk
    # plus a tiny jnp tail (no whole-array masked stores).
    x2 = jax.random.normal(k1, (3, 5, 7, 32), dtype=jnp.float32)
    y2 = jax.block_until_ready(activation_feature_map(x2))
    assert jnp.allclose(y2, _ref(x2), atol=1e-6, rtol=1e-6)

    # Multi-block grid with a clipped (ragged) last row-block.
    x3 = jax.random.normal(k2, (18, 4, 16, 32), dtype=jnp.float32)
    y3 = jax.block_until_ready(activation_feature_map(x3, block_bytes=32 * 1024))
    assert jnp.allclose(y3, _ref(x3), atol=1e-6, rtol=1e-6)

    # >512 KiB array: exercises the forced multi-step (pipelined) path.
    x4 = jax.random.normal(k3, (8, 128, 4, 64), dtype=jnp.float32)
    y4 = jax.block_until_ready(activation_feature_map(x4))
    assert jnp.allclose(y4, _ref(x4), atol=1e-6, rtol=1e-6)

    # bf16 I/O: native bf16 compute path (loose tolerance vs f32 reference).
    xb = jax.random.normal(k0, (batch, seq, heads, query_dims), dtype=jnp.bfloat16)
    yb = jax.block_until_ready(activation_feature_map(xb))
    assert yb.dtype == jnp.bfloat16
    assert jnp.allclose(yb.astype(jnp.float32), _ref(xb).astype(jnp.float32),
                        atol=5e-2, rtol=5e-2)

    print("KERNEL_OK")
</pallas_src>

<mosaic_0001>
module attributes {stable_mosaic.version = 11 : i64} {
  func.func @_elu_plus_one_kernel(%arg0: i32, %arg1: memref<8x256xf32, #tpu.memory_space<vmem>>, %arg2: memref<8x256xf32, #tpu.memory_space<vmem>>) attributes {dimension_semantics = [#tpu.dimension_semantics<parallel>], iteration_bounds = array<i64: 1>, scalar_prefetch = 0 : i64, scratch_operands = 0 : i64, tpu.core_type = #tpu.core_type<tc>, window_params = [{transform_indices = @transform_0, window_bounds = array<i64: 8, 256>}, {transform_indices = @transform_1, window_bounds = array<i64: 8, 256>}]} {
    %c0 = arith.constant 0 : index
    %c0_0 = arith.constant 0 : index
    %0 = vector.load %arg1[%c0, %c0_0] : memref<8x256xf32, #tpu.memory_space<vmem>>, vector<8x256xf32>
    %cst = arith.constant 0.000000e+00 : f32
    %1 = vector.broadcast %cst : f32 to vector<8x256xf32>
    %2 = arith.minimumf %0, %1 : vector<8x256xf32>
    %3 = math.exp %2 : vector<8x256xf32>
    %cst_1 = arith.constant 0.000000e+00 : f32
    %4 = vector.broadcast %cst_1 : f32 to vector<8x256xf32>
    %5 = arith.cmpf ogt, %0, %4 : vector<8x256xf32>
    %cst_2 = arith.constant 1.000000e+00 : f32
    %6 = vector.broadcast %cst_2 : f32 to vector<8x256xf32>
    %7 = arith.addf %0, %6 : vector<8x256xf32>
    %8 = arith.select %5, %7, %3 : vector<8x256xi1>, vector<8x256xf32>
    %c0_3 = arith.constant 0 : index
    %c0_4 = arith.constant 0 : index
    %9 = vector.load %arg2[%c0_3, %c0_4] : memref<8x256xf32, #tpu.memory_space<vmem>>, vector<8x256xf32>
    tpu.vector_store %arg2[%c0_3, %c0_4], %8 {strides = array<i32>} : memref<8x256xf32, #tpu.memory_space<vmem>>, vector<8x256xf32>,
    return
  }
  func.func @transform_0(%arg0: i32) -> (i32, i32) {
    %c0_i32 = arith.constant 0 : i32
    %c0_i32_0 = arith.constant 0 : i32
    return %arg0, %c0_i32 : i32, i32
  }
  func.func @transform_1(%arg0: i32) -> (i32, i32) {
    %c0_i32 = arith.constant 0 : i32
    %c0_i32_0 = arith.constant 0 : i32
    return %arg0, %c0_i32 : i32, i32
  }
}

</mosaic_0001>

<bundles_post_ra>
// kernel: tpu_custom_call.1
= control target key start
LH: loop header
LB: loop body
LE: loop exit
PB: predicated region body
PF: predicated region fallthrough
CT: control target
= control target key end

     0   :  { %6 = vsyncpa [#allocation3], 0  ;;  %s142_s0 = inlined_call_operand.hbm [shape: f32[8,256], index: 0, kind: input, shape index: {}]   ;;  %s143_s1 = inlined_call_operand.hbm [shape: f32[8,256], index: 1, kind: output, shape index: {}]  }
   0x1   :  { %7 = vsyncpa [#allocation4], 0  ;;  %s106_s6 = smov [#allocation2]   ;;  %s58_s10 = scalar_lea.hbm %s142_s0, 256 }
   0x2   :  { %s14_s7 = sshll.u32 %s106_s6, 4  ;;  %p59_p0 = scmp.ne.s32.totalorder %s142_s0, %s58_s10  ;;  %s15_s7 = int_to_ptr.vmem [resolvable:$true] %s14_s7 }
   0x3   :  { %p62_p1 = scmp.lt.u32.totalorder %s58_s10, %s142_s0 }
   0x5   :  { %p64_p2 = pnand %p62_p1, %p59_p0 }
   0x7   :  { %67 = shalt.err (!%p64_p2)
}
   0x8   :  { %s68_s15 = scalar_lea.vmem %s15_s7, 256  ;;  %p73_p4 = scmp.lt.s32.totalorder %s15_s7, %s15_s7 }
   0x9   :  { %p69_p3 = scmp.ne.s32.totalorder %s15_s7, %s68_s15  ;;  %p74_p5 = scmp.lt.s32.totalorder %s68_s15, %s68_s15 }
   0xb   :  { %p75_p6 = por %p74_p5, %p73_p4 }
   0xd   :  { %p76_p7 = pnand %p75_p6, %p69_p3 }
   0xf   :  { %79 = shalt.err (!%p76_p7)
}
  0x10   :  { %17 = dma.hbm_to_vmem [thread:$0]  %s142_s0, 256, %s15_s7, [#allocation3]  }
  0x11   :  { %102 = dma.done.wait [#allocation3], 256  }
  0x12   :  { %103 = vsyncadd [#allocation3], 4294967040  ;;  %v21_v0 = vld [vmem:[#allocation2] sm:$0xff]  ;;  %v22_v1 = vld [vmem:[#allocation2 + $0x8] sm:$0xff]  ;;  %s107_s18 = smov [#allocation5]  }
  0x13   :  { %v23_v2 = vmin.f32 %v21_v0, 0.0  ;;  %v24_v3 = vmin.f32 %v22_v1, 0.0  ;;  %v31_v6 = vadd.f32 1.0, %v21_v0  ;;  %vm29_vm0 = vcmp.gt.f32.partialorder %v21_v0, 0.0  ;;  %s43_s19 = sshll.u32 %s107_s18, 4  ;;  %s44_s19 = int_to_ptr.vmem [resolvable:$true] %s43_s19 }
  0x14   :  { %v32_v7 = vadd.f32 1.0, %v22_v1  ;;  %vm30_vm1 = vcmp.gt.f32.partialorder %v22_v1, 0.0  ;;  %s80_s0 = scalar_lea.vmem %s44_s19, 256  ;;  %p85_p9 = scmp.lt.s32.totalorder %s44_s19, %s44_s19 }
  0x15   :  { %v25_v4 = vmul.f32 1.442695, %v23_v2  ;;  %v27_v5 = vmul.f32 1.442695, %v24_v3  ;;  %p81_p8 = scmp.ne.s32.totalorder %s44_s19, %s80_s0  ;;  %p86_p10 = scmp.lt.s32.totalorder %s80_s0, %s80_s0 }
  0x17   :  { %54 = vpow2.f32 %v25_v4  ;;  %p87_p11 = por %p86_p10, %p85_p9 }
  0x18   :  { %56 = vpow2.f32 %v27_v5 }
  0x19   :  { %p88_p12 = pnand %p87_p11, %p81_p8 }
  0x21   :  { %v55_v8 = vpop.eup %54 }
  0x22   :  { %v57_v9 = vpop.eup %56  ;;  %v33_v10 = vsel %vm29_vm0, %v31_v6, %v55_v8 }
  0x23   :  { %35 = vst [vmem:[#allocation5] sm:$0xff] %v33_v10  ;;  %v34_v11 = vsel %vm30_vm1, %v32_v7, %v57_v9 }
  0x24   :  { %36 = vst [vmem:[#allocation5 + $0x8] sm:$0xff] %v34_v11 }
  0x25   :  { %91 = shalt.err (!%p88_p12)
}
  0x26   :  { %s92_s22 = scalar_lea.hbm %s143_s1, 256 }
  0x27   :  { %p93_p13 = scmp.ne.s32.totalorder %s143_s1, %s92_s22  ;;  %p96_p0 = scmp.lt.u32.totalorder %s92_s22, %s143_s1 }
  0x29   :  { %p98_p1 = pnand %p96_p0, %p93_p13 }
  0x2b   :  { %101 = shalt.err (!%p98_p1)
}
  0x2c   :  { %46 = dma.vmem_to_hbm [thread:$0]  %s44_s19, 256, %s143_s1, [#allocation4]  }
  0x2d   :  { %104 = dma.done.wait [#allocation4], 256  }
  0x2e   :  { %105 = vsyncadd [#allocation4], 4294967040 }
  0x2f   :  { %50 = vsyncpa [#allocation3], 1 }
  0x30   :  { %51 = vsyncpa [#allocation4], 1 }

</bundles_post_ra>
